<compile_context>
chip_gen: v6e
topology: v6e:2x2x1
jax: 0.10.0
libtpu: 0.0.40
codegen_flags: <defaults>
</compile_context>

<pallas_src>
import jax
import jax.numpy as jnp
from jax.experimental import pallas as pl
from jax.experimental.pallas import tpu as pltpu

NUM_LANDMARKS = 8            # -> logical input features = 2 * 8 = 16
IN_DIM = 2 * NUM_LANDMARKS
HIDDEN_LOGICAL = 100         # hidden width of the PyTorch module
HIDDEN = 128                 # lane-aligned padded hidden width used in-kernel
BN_EPS = 1e-5                # PyTorch BatchNorm1d default eps


# ---------------------------------------------------------------------------
# Kernel
# ---------------------------------------------------------------------------
def radius_regressor_kernel(x_ref, w0_ref, wm_ref, p_ref, bo_ref, out_ref):
    """Single-step kernel; everything resident in VMEM.

    x_ref  : (B, 16)        f32  flattened landmarks (no padding)
    w0_ref : (16, 128)      bf16 layer-0 weight (cols >= 100 are zero)
    wm_ref : (3, 128, 128)  bf16 layers 1-3 weights (rows/cols >= 100 zero)
    p_ref  : (9, 128)       f32  rows 0..3 = BN gamma (padded lanes 0),
                                 rows 4..7 = BN beta (padded lanes 0),
                                 row 8 = final-layer weight row (padded 0)
    bo_ref : (1,)           f32  final-layer bias (SMEM scalar)
    out_ref: (B, 1)         f32
    """
    P = p_ref[...]                               # load the whole slab once
    inv_b = 1.0 / x_ref.shape[0]                 # static Python float

    def bn_relu(h, layer):
        gamma = P[layer:layer + 1, :]            # (1, 128), in-register slice
        beta = P[4 + layer:5 + layer, :]         # (1, 128)
        # Single-pass batch statistics (f32 throughout).
        s1 = jnp.sum(h, axis=0, keepdims=True)
        s2 = jnp.sum(h * h, axis=0, keepdims=True)
        mu = s1 * inv_b
        var = s2 * inv_b - mu * mu
        # Fold gamma into the normalization: one (1,128) prep (EUP rsqrt is a
        # free slot), then a single mul+add per element.
        s = gamma * jax.lax.rsqrt(var + BN_EPS)  # (1, 128)
        t = beta - mu * s                        # (1, 128)
        return jnp.maximum(h * s + t, 0.0)

    # Layer 0: (B,16) x (16,128) — bf16 operands, f32 accumulation.
    h = jnp.dot(x_ref[...].astype(jnp.bfloat16), w0_ref[...],
                preferred_element_type=jnp.float32)
    h = bn_relu(h, 0)

    # Layers 1..3 (Linear biases dropped; cancelled by train-mode BN).
    for layer in range(3):
        h = jnp.dot(h.astype(jnp.bfloat16), wm_ref[layer],
                    preferred_element_type=jnp.float32)
        h = bn_relu(h, layer + 1)

    # Final Linear(100, 1): VPU multiply + XLU lane reduction (keeps the MXU
    # drain off the kernel tail; only 1 of >=128 MXU columns would be used).
    wo = P[8:9, :]                               # (1, 128), zero beyond 100
    out = jnp.sum(h * wo, axis=-1, keepdims=True) + bo_ref[0]
    out_ref[...] = out.astype(out_ref.dtype)


# ---------------------------------------------------------------------------
# Wrapper
# ---------------------------------------------------------------------------
@jax.jit
def radius_regressor(x, packed):
    """x: (B, L, 2) float32 -> (B, 1) float32."""
    B = x.shape[0]
    x_flat = x.reshape(B, -1).astype(jnp.float32)          # nn.Flatten()

    vmem = pl.BlockSpec(memory_space=pltpu.MemorySpace.VMEM)
    smem = pl.BlockSpec(memory_space=pltpu.MemorySpace.SMEM)
    return pl.pallas_call(
        radius_regressor_kernel,
        out_shape=jax.ShapeDtypeStruct((B, 1), jnp.float32),
        in_specs=[vmem, vmem, vmem, vmem, smem],
        out_specs=vmem,
        compiler_params=pltpu.CompilerParams(
            vmem_limit_bytes=16 * 1024 * 1024,   # explicit cap; safe on v7x
        ),
    )(x_flat, packed["W0"], packed["WM"], packed["P"], packed["bo"])


# ---------------------------------------------------------------------------
# Parameters: logical (PyTorch-like, used by the reference) + packed (kernel)
# ---------------------------------------------------------------------------
def init_params(key, num_landmarks=NUM_LANDMARKS, hidden=HIDDEN_LOGICAL):
    """Deterministic synthetic parameters (PyTorch-like uniform fan-in init)."""
    in_dim = 2 * num_landmarks
    ks = jax.random.split(key, 16)

    def lin(k, fan_in, fan_out):
        kw, kb = jax.random.split(k)
        bound = 1.0 / (fan_in ** 0.5)
        w = jax.random.uniform(kw, (fan_in, fan_out), jnp.float32, -bound, bound)
        b = jax.random.uniform(kb, (fan_out,), jnp.float32, -bound, bound)
        return w, b

    w0, b0 = lin(ks[0], in_dim, hidden)
    wm, bm = [], []
    for i in range(3):
        w, b = lin(ks[1 + i], hidden, hidden)
        wm.append(w)
        bm.append(b)
    wo, bo = lin(ks[4], hidden, 1)

    g = 1.0 + 0.05 * jax.random.normal(ks[5], (4, hidden), jnp.float32)
    be = 0.05 * jax.random.normal(ks[6], (4, hidden), jnp.float32)

    return dict(w0=w0, b0=b0, wm=jnp.stack(wm), bm=jnp.stack(bm),
                wo=wo, bo=bo, g=g, be=be)


def pack_params(lp, num_landmarks=NUM_LANDMARKS):
    """Pad to lane-aligned HIDDEN=128, cast weights to bf16, pack operands."""
    in_dim = 2 * num_landmarks
    HL = HIDDEN_LOGICAL

    W0 = jnp.zeros((in_dim, HIDDEN), jnp.float32)
    W0 = W0.at[:, :HL].set(lp["w0"]).astype(jnp.bfloat16)

    WM = jnp.zeros((3, HIDDEN, HIDDEN), jnp.float32)
    WM = WM.at[:, :HL, :HL].set(lp["wm"]).astype(jnp.bfloat16)
    # Note: Linear biases b0/bm are intentionally NOT packed — cancelled by
    # train-mode BatchNorm (batch-mean subtraction).

    P = jnp.zeros((9, HIDDEN), jnp.float32)
    P = P.at[0:4, :HL].set(lp["g"])           # gammas (padded lanes = 0)
    P = P.at[4:8, :HL].set(lp["be"])          # betas  (padded lanes = 0)
    P = P.at[8, :HL].set(lp["wo"][:, 0])      # final weight row

    bo = lp["bo"].astype(jnp.float32)         # (1,) scalar -> SMEM operand
    return dict(W0=W0, WM=WM, P=P, bo=bo)


# ---------------------------------------------------------------------------
# Pure-JAX references
# ---------------------------------------------------------------------------
def radius_regressor_ref(x, lp):
    """Exact PyTorch mirror: f32 weights, Linear biases, two-pass BN var."""
    h = x.reshape(x.shape[0], -1).astype(jnp.float32)

    def bn_relu(h, gamma, beta):
        mu = jnp.mean(h, axis=0, keepdims=True)
        var = jnp.mean((h - mu) ** 2, axis=0, keepdims=True)
        return jnp.maximum((h - mu) * jax.lax.rsqrt(var + BN_EPS) * gamma + beta,
                           0.0)

    h = bn_relu(h @ lp["w0"] + lp["b0"], lp["g"][0], lp["be"][0])
    for i in range(3):
        h = bn_relu(h @ lp["wm"][i] + lp["bm"][i], lp["g"][i + 1], lp["be"][i + 1])
    return h @ lp["wo"] + lp["bo"]


def radius_regressor_kernel_ref(x, packed):
    """Mirrors the kernel's math path (bf16 matmuls, single-pass BN stats)."""
    B = x.shape[0]
    h = x.reshape(B, -1).astype(jnp.float32)
    P = packed["P"]
    inv_b = 1.0 / B

    def bn_relu(h, layer):
        gamma = P[layer:layer + 1, :]
        beta = P[4 + layer:5 + layer, :]
        s1 = jnp.sum(h, axis=0, keepdims=True)
        s2 = jnp.sum(h * h, axis=0, keepdims=True)
        mu = s1 * inv_b
        var = s2 * inv_b - mu * mu
        s = gamma * jax.lax.rsqrt(var + BN_EPS)
        t = beta - mu * s
        return jnp.maximum(h * s + t, 0.0)

    h = jnp.dot(h.astype(jnp.bfloat16), packed["W0"],
                preferred_element_type=jnp.float32)
    h = bn_relu(h, 0)
    for i in range(3):
        h = jnp.dot(h.astype(jnp.bfloat16), packed["WM"][i],
                    preferred_element_type=jnp.float32)
        h = bn_relu(h, i + 1)
    return jnp.sum(h * P[8:9, :], axis=-1, keepdims=True) + packed["bo"][0]


if __name__ == "__main__":
    key = jax.random.PRNGKey(0)
    kx, kp = jax.random.split(key)

    B = 8
    x = jax.random.normal(kx, (B, NUM_LANDMARKS, 2), jnp.float32)
    logical = init_params(kp)
    packed = pack_params(logical)

    out = jax.block_until_ready(radius_regressor(x, packed))
    assert out.shape == (B, 1) and out.dtype == jnp.float32

    # Tight check: kernel vs a JAX reference following the identical math path
    # (bf16 matmuls / f32 accumulation / single-pass BN stats).
    ref_path = radius_regressor_kernel_ref(x, packed)
    assert jnp.allclose(out, ref_path, atol=1e-3, rtol=1e-3), (out, ref_path)

    # Loose check: kernel vs the exact f32 PyTorch-semantics reference; the
    # difference is the intentional bf16 weight quantization + E[x^2]-mu^2 var.
    ref_exact = radius_regressor_ref(x, logical)
    assert jnp.allclose(out, ref_exact, atol=5e-2, rtol=5e-2), (out, ref_exact)

    print("KERNEL_OK")
</pallas_src>

<mosaic_0001>
module attributes {stable_mosaic.version = 11 : i64} {
  func.func @radius_regressor_kernel(%arg0: memref<8x16xf32, #tpu.memory_space<vmem>>, %arg1: memref<16x128xbf16, #tpu.memory_space<vmem>>, %arg2: memref<3x128x128xbf16, #tpu.memory_space<vmem>>, %arg3: memref<9x128xf32, #tpu.memory_space<vmem>>, %arg4: memref<1xf32, #tpu.memory_space<smem>>, %arg5: memref<8x1xf32, #tpu.memory_space<vmem>>) attributes {dimension_semantics = [], scalar_prefetch = 0 : i64, scratch_operands = 0 : i64, tpu.core_type = #tpu.core_type<tc>} {
    %c0 = arith.constant 0 : index
    %c0_0 = arith.constant 0 : index
    %0 = vector.load %arg3[%c0, %c0_0] : memref<9x128xf32, #tpu.memory_space<vmem>>, vector<9x128xf32>
    %c0_1 = arith.constant 0 : index
    %c0_2 = arith.constant 0 : index
    %1 = vector.load %arg0[%c0_1, %c0_2] : memref<8x16xf32, #tpu.memory_space<vmem>>, vector<8x16xf32>
    %2 = arith.truncf %1 : vector<8x16xf32> to vector<8x16xbf16>
    %c0_3 = arith.constant 0 : index
    %c0_4 = arith.constant 0 : index
    %3 = vector.load %arg1[%c0_3, %c0_4] : memref<16x128xbf16, #tpu.memory_space<vmem>>, vector<16x128xbf16>
    %cst = arith.constant dense<0.000000e+00> : vector<8x128xf32>
    %4 = tpu.matmul %2, %3, %cst {dimension_numbers = #tpu.dot_dimension_numbers<[1], [0], [0], [1], [0, 0, 1, 1], [], []>} : vector<8x16xbf16>, vector<16x128xbf16>, vector<8x128xf32> -> vector<8x128xf32>
    %5 = vector.extract_strided_slice %0 {offsets = [0, 0], sizes = [1, 128], strides = [1, 1]} : vector<9x128xf32> to vector<1x128xf32>
    %6 = vector.extract_strided_slice %0 {offsets = [4, 0], sizes = [1, 128], strides = [1, 1]} : vector<9x128xf32> to vector<1x128xf32>
    %cst_5 = arith.constant dense<0.000000e+00> : vector<128xf32>
    %7 = vector.multi_reduction <add>, %4, %cst_5 [0] : vector<8x128xf32> to vector<128xf32>
    %8 = vector.shape_cast %7 : vector<128xf32> to vector<1x128xf32>
    %9 = arith.mulf %4, %4 : vector<8x128xf32>
    %cst_6 = arith.constant dense<0.000000e+00> : vector<128xf32>
    %10 = vector.multi_reduction <add>, %9, %cst_6 [0] : vector<8x128xf32> to vector<128xf32>
    %11 = vector.shape_cast %10 : vector<128xf32> to vector<1x128xf32>
    %cst_7 = arith.constant 1.250000e-01 : f32
    %12 = vector.broadcast %cst_7 : f32 to vector<1x128xf32>
    %13 = arith.mulf %8, %12 : vector<1x128xf32>
    %cst_8 = arith.constant 1.250000e-01 : f32
    %14 = vector.broadcast %cst_8 : f32 to vector<1x128xf32>
    %15 = arith.mulf %11, %14 : vector<1x128xf32>
    %16 = arith.mulf %13, %13 : vector<1x128xf32>
    %17 = arith.subf %15, %16 : vector<1x128xf32>
    %cst_9 = arith.constant 9.99999974E-6 : f32
    %18 = vector.broadcast %cst_9 : f32 to vector<1x128xf32>
    %19 = arith.addf %17, %18 : vector<1x128xf32>
    %20 = math.rsqrt %19 : vector<1x128xf32>
    %21 = arith.mulf %5, %20 : vector<1x128xf32>
    %22 = arith.mulf %13, %21 : vector<1x128xf32>
    %23 = arith.subf %6, %22 : vector<1x128xf32>
    %24 = vector.broadcast %21 : vector<1x128xf32> to vector<8x128xf32>
    %25 = arith.mulf %4, %24 : vector<8x128xf32>
    %26 = vector.broadcast %23 : vector<1x128xf32> to vector<8x128xf32>
    %27 = arith.addf %25, %26 : vector<8x128xf32>
    %cst_10 = arith.constant 0.000000e+00 : f32
    %28 = vector.broadcast %cst_10 : f32 to vector<8x128xf32>
    %29 = arith.maximumf %27, %28 : vector<8x128xf32>
    %30 = arith.truncf %29 : vector<8x128xf32> to vector<8x128xbf16>
    %c0_11 = arith.constant 0 : index
    %c0_12 = arith.constant 0 : index
    %c0_13 = arith.constant 0 : index
    %31 = vector.load %arg2[%c0_11, %c0_12, %c0_13] : memref<3x128x128xbf16, #tpu.memory_space<vmem>>, vector<1x128x128xbf16>
    %32 = vector.shape_cast %31 : vector<1x128x128xbf16> to vector<128x128xbf16>
    %cst_14 = arith.constant dense<0.000000e+00> : vector<8x128xf32>
    %33 = tpu.matmul %30, %32, %cst_14 {dimension_numbers = #tpu.dot_dimension_numbers<[1], [0], [0], [1], [0, 0, 1, 1], [], []>} : vector<8x128xbf16>, vector<128x128xbf16>, vector<8x128xf32> -> vector<8x128xf32>
    %34 = vector.extract_strided_slice %0 {offsets = [1, 0], sizes = [1, 128], strides = [1, 1]} : vector<9x128xf32> to vector<1x128xf32>
    %35 = vector.extract_strided_slice %0 {offsets = [5, 0], sizes = [1, 128], strides = [1, 1]} : vector<9x128xf32> to vector<1x128xf32>
    %cst_15 = arith.constant dense<0.000000e+00> : vector<128xf32>
    %36 = vector.multi_reduction <add>, %33, %cst_15 [0] : vector<8x128xf32> to vector<128xf32>
    %37 = vector.shape_cast %36 : vector<128xf32> to vector<1x128xf32>
    %38 = arith.mulf %33, %33 : vector<8x128xf32>
    %cst_16 = arith.constant dense<0.000000e+00> : vector<128xf32>
    %39 = vector.multi_reduction <add>, %38, %cst_16 [0] : vector<8x128xf32> to vector<128xf32>
    %40 = vector.shape_cast %39 : vector<128xf32> to vector<1x128xf32>
    %cst_17 = arith.constant 1.250000e-01 : f32
    %41 = vector.broadcast %cst_17 : f32 to vector<1x128xf32>
    %42 = arith.mulf %37, %41 : vector<1x128xf32>
    %cst_18 = arith.constant 1.250000e-01 : f32
    %43 = vector.broadcast %cst_18 : f32 to vector<1x128xf32>
    %44 = arith.mulf %40, %43 : vector<1x128xf32>
    %45 = arith.mulf %42, %42 : vector<1x128xf32>
    %46 = arith.subf %44, %45 : vector<1x128xf32>
    %cst_19 = arith.constant 9.99999974E-6 : f32
    %47 = vector.broadcast %cst_19 : f32 to vector<1x128xf32>
    %48 = arith.addf %46, %47 : vector<1x128xf32>
    %49 = math.rsqrt %48 : vector<1x128xf32>
    %50 = arith.mulf %34, %49 : vector<1x128xf32>
    %51 = arith.mulf %42, %50 : vector<1x128xf32>
    %52 = arith.subf %35, %51 : vector<1x128xf32>
    %53 = vector.broadcast %50 : vector<1x128xf32> to vector<8x128xf32>
    %54 = arith.mulf %33, %53 : vector<8x128xf32>
    %55 = vector.broadcast %52 : vector<1x128xf32> to vector<8x128xf32>
    %56 = arith.addf %54, %55 : vector<8x128xf32>
    %cst_20 = arith.constant 0.000000e+00 : f32
    %57 = vector.broadcast %cst_20 : f32 to vector<8x128xf32>
    %58 = arith.maximumf %56, %57 : vector<8x128xf32>
    %59 = arith.truncf %58 : vector<8x128xf32> to vector<8x128xbf16>
    %c1 = arith.constant 1 : index
    %c0_21 = arith.constant 0 : index
    %c0_22 = arith.constant 0 : index
    %60 = vector.load %arg2[%c1, %c0_21, %c0_22] : memref<3x128x128xbf16, #tpu.memory_space<vmem>>, vector<1x128x128xbf16>
    %61 = vector.shape_cast %60 : vector<1x128x128xbf16> to vector<128x128xbf16>
    %cst_23 = arith.constant dense<0.000000e+00> : vector<8x128xf32>
    %62 = tpu.matmul %59, %61, %cst_23 {dimension_numbers = #tpu.dot_dimension_numbers<[1], [0], [0], [1], [0, 0, 1, 1], [], []>} : vector<8x128xbf16>, vector<128x128xbf16>, vector<8x128xf32> -> vector<8x128xf32>
    %63 = vector.extract_strided_slice %0 {offsets = [2, 0], sizes = [1, 128], strides = [1, 1]} : vector<9x128xf32> to vector<1x128xf32>
    %64 = vector.extract_strided_slice %0 {offsets = [6, 0], sizes = [1, 128], strides = [1, 1]} : vector<9x128xf32> to vector<1x128xf32>
    %cst_24 = arith.constant dense<0.000000e+00> : vector<128xf32>
    %65 = vector.multi_reduction <add>, %62, %cst_24 [0] : vector<8x128xf32> to vector<128xf32>
    %66 = vector.shape_cast %65 : vector<128xf32> to vector<1x128xf32>
    %67 = arith.mulf %62, %62 : vector<8x128xf32>
    %cst_25 = arith.constant dense<0.000000e+00> : vector<128xf32>
    %68 = vector.multi_reduction <add>, %67, %cst_25 [0] : vector<8x128xf32> to vector<128xf32>
    %69 = vector.shape_cast %68 : vector<128xf32> to vector<1x128xf32>
    %cst_26 = arith.constant 1.250000e-01 : f32
    %70 = vector.broadcast %cst_26 : f32 to vector<1x128xf32>
    %71 = arith.mulf %66, %70 : vector<1x128xf32>
    %cst_27 = arith.constant 1.250000e-01 : f32
    %72 = vector.broadcast %cst_27 : f32 to vector<1x128xf32>
    %73 = arith.mulf %69, %72 : vector<1x128xf32>
    %74 = arith.mulf %71, %71 : vector<1x128xf32>
    %75 = arith.subf %73, %74 : vector<1x128xf32>
    %cst_28 = arith.constant 9.99999974E-6 : f32
    %76 = vector.broadcast %cst_28 : f32 to vector<1x128xf32>
    %77 = arith.addf %75, %76 : vector<1x128xf32>
    %78 = math.rsqrt %77 : vector<1x128xf32>
    %79 = arith.mulf %63, %78 : vector<1x128xf32>
    %80 = arith.mulf %71, %79 : vector<1x128xf32>
    %81 = arith.subf %64, %80 : vector<1x128xf32>
    %82 = vector.broadcast %79 : vector<1x128xf32> to vector<8x128xf32>
    %83 = arith.mulf %62, %82 : vector<8x128xf32>
    %84 = vector.broadcast %81 : vector<1x128xf32> to vector<8x128xf32>
    %85 = arith.addf %83, %84 : vector<8x128xf32>
    %cst_29 = arith.constant 0.000000e+00 : f32
    %86 = vector.broadcast %cst_29 : f32 to vector<8x128xf32>
    %87 = arith.maximumf %85, %86 : vector<8x128xf32>
    %88 = arith.truncf %87 : vector<8x128xf32> to vector<8x128xbf16>
    %c2 = arith.constant 2 : index
    %c0_30 = arith.constant 0 : index
    %c0_31 = arith.constant 0 : index
    %89 = vector.load %arg2[%c2, %c0_30, %c0_31] : memref<3x128x128xbf16, #tpu.memory_space<vmem>>, vector<1x128x128xbf16>
    %90 = vector.shape_cast %89 : vector<1x128x128xbf16> to vector<128x128xbf16>
    %cst_32 = arith.constant dense<0.000000e+00> : vector<8x128xf32>
    %91 = tpu.matmul %88, %90, %cst_32 {dimension_numbers = #tpu.dot_dimension_numbers<[1], [0], [0], [1], [0, 0, 1, 1], [], []>} : vector<8x128xbf16>, vector<128x128xbf16>, vector<8x128xf32> -> vector<8x128xf32>
    %92 = vector.extract_strided_slice %0 {offsets = [3, 0], sizes = [1, 128], strides = [1, 1]} : vector<9x128xf32> to vector<1x128xf32>
    %93 = vector.extract_strided_slice %0 {offsets = [7, 0], sizes = [1, 128], strides = [1, 1]} : vector<9x128xf32> to vector<1x128xf32>
    %cst_33 = arith.constant dense<0.000000e+00> : vector<128xf32>
    %94 = vector.multi_reduction <add>, %91, %cst_33 [0] : vector<8x128xf32> to vector<128xf32>
    %95 = vector.shape_cast %94 : vector<128xf32> to vector<1x128xf32>
    %96 = arith.mulf %91, %91 : vector<8x128xf32>
    %cst_34 = arith.constant dense<0.000000e+00> : vector<128xf32>
    %97 = vector.multi_reduction <add>, %96, %cst_34 [0] : vector<8x128xf32> to vector<128xf32>
    %98 = vector.shape_cast %97 : vector<128xf32> to vector<1x128xf32>
    %cst_35 = arith.constant 1.250000e-01 : f32
    %99 = vector.broadcast %cst_35 : f32 to vector<1x128xf32>
    %100 = arith.mulf %95, %99 : vector<1x128xf32>
    %cst_36 = arith.constant 1.250000e-01 : f32
    %101 = vector.broadcast %cst_36 : f32 to vector<1x128xf32>
    %102 = arith.mulf %98, %101 : vector<1x128xf32>
    %103 = arith.mulf %100, %100 : vector<1x128xf32>
    %104 = arith.subf %102, %103 : vector<1x128xf32>
    %cst_37 = arith.constant 9.99999974E-6 : f32
    %105 = vector.broadcast %cst_37 : f32 to vector<1x128xf32>
    %106 = arith.addf %104, %105 : vector<1x128xf32>
    %107 = math.rsqrt %106 : vector<1x128xf32>
    %108 = arith.mulf %92, %107 : vector<1x128xf32>
    %109 = arith.mulf %100, %108 : vector<1x128xf32>
    %110 = arith.subf %93, %109 : vector<1x128xf32>
    %111 = vector.broadcast %108 : vector<1x128xf32> to vector<8x128xf32>
    %112 = arith.mulf %91, %111 : vector<8x128xf32>
    %113 = vector.broadcast %110 : vector<1x128xf32> to vector<8x128xf32>
    %114 = arith.addf %112, %113 : vector<8x128xf32>
    %cst_38 = arith.constant 0.000000e+00 : f32
    %115 = vector.broadcast %cst_38 : f32 to vector<8x128xf32>
    %116 = arith.maximumf %114, %115 : vector<8x128xf32>
    %117 = vector.extract_strided_slice %0 {offsets = [8, 0], sizes = [1, 128], strides = [1, 1]} : vector<9x128xf32> to vector<1x128xf32>
    %118 = vector.broadcast %117 : vector<1x128xf32> to vector<8x128xf32>
    %119 = arith.mulf %116, %118 : vector<8x128xf32>
    %cst_39 = arith.constant dense<0.000000e+00> : vector<8xf32>
    %120 = vector.multi_reduction <add>, %119, %cst_39 [1] : vector<8x128xf32> to vector<8xf32>
    %121 = vector.shape_cast %120 : vector<8xf32> to vector<8x1xf32>
    %c0_40 = arith.constant 0 : index
    %122 = memref.load %arg4[%c0_40] : memref<1xf32, #tpu.memory_space<smem>>
    %123 = vector.broadcast %122 : f32 to vector<8x1xf32>
    %124 = arith.addf %121, %123 : vector<8x1xf32>
    %c0_41 = arith.constant 0 : index
    %c0_42 = arith.constant 0 : index
    %125 = vector.load %arg5[%c0_41, %c0_42] : memref<8x1xf32, #tpu.memory_space<vmem>>, vector<8x1xf32>
    tpu.vector_store %arg5[%c0_41, %c0_42], %124 {strides = array<i32>} : memref<8x1xf32, #tpu.memory_space<vmem>>, vector<8x1xf32>,
    return
  }
}

</mosaic_0001>

<bundles_post_ra>
// kernel: radius_regressor.1
= control target key start
LH: loop header
LB: loop body
LE: loop exit
PB: predicated region body
PF: predicated region fallthrough
CT: control target
= control target key end

     0   :  { %11 = vsyncpa [#allocation4], 0  ;;  %s752_s18 = smov [#allocation3]   ;;  %s861_s0 = inlined_call_operand.vmem [shape: f32[8,16], index: 0, kind: input, shape index: {}]   ;;  %s862_s1 = inlined_call_operand.vmem [shape: bf16[16,128], index: 1, kind: input, shape index: {}]   ;;  %s863_s2 = inlined_call_operand.hbm [shape: bf16[3,128,128], index: 2, kind: input, shape index: {}]   ;;  %s864_s3 = inlined_call_operand.vmem [shape: f32[9,128], index: 3, kind: input, shape index: {}]   ;;  %s865_s4 = inlined_call_operand.<no memory space> [shape: f32[1], index: 4, kind: input, shape index: {}]   ;;  %s866_s5 = inlined_call_operand.vmem [shape: f32[8,1], index: 5, kind: output, shape index: {}]  }
   0x1   :  { %s21_s19 = sshll.u32 %s752_s18, 4  ;;  %s22_s19 = int_to_ptr.vmem [resolvable:$true] %s21_s19 }
   0x2   :  { %s738_s20 = scalar_lea.vmem %s22_s19, 3072  ;;  %p743_p1 = scmp.lt.s32.totalorder %s22_s19, %s22_s19 }
   0x3   :  { %p739_p0 = scmp.ne.s32.totalorder %s22_s19, %s738_s20  ;;  %p744_p2 = scmp.lt.s32.totalorder %s738_s20, %s738_s20 }
   0x5   :  { %p745_p3 = por %p744_p2, %p743_p1 }
   0x7   :  { %p746_p4 = pnand %p745_p3, %p739_p0 }
   0x9   :  { %749 = shalt.err (!%p746_p4)
}
   0xa   :  { %s753_s21 = smov 64   ;;  %s754_s22 = smov 4  }
   0xb   :  { %27 = dma.hbm_to_vmem [thread:$0]  %s863_s2, 3072, %s22_s19, [#allocation4], %s753_s21, %s753_s21, %s754_s22  }
   0xc   :  { %750 = dma.done.wait [#allocation4], 3072  }
   0xd   :  { %751 = vsyncadd [#allocation4], 4294964224  ;;  %v755_v0 = vmov 0.0   ;;  %vm756_vm0 = vmmov 0   ;;  %v697_v1 = vld [vmem:[%s862_s1] sm:$0xff]   ;;  %vm48_vm1 = vcmask 130048   ;;  %v117_v34 = vlaneseq }
   0xe   :  { %626 = vmatprep.subr.bf16.mxu0 %v755_v0  ;;  %628 = vmatprep.mubr.msk.bf16.mxu0 %vm756_vm0, %v755_v0  ;;  %v38_v2 = vld [vmem:[%s861_s0] sm:$0xff]  ;;  %v698_v4 = vld [vmem:[#allocation3 + $0x38] sm:$0xff]   ;;  %v699_v5 = vld [vmem:[#allocation3 + $0x30] sm:$0xff]   ;;  %vm563_vm2 = vcmask 7168  }
   0xf   :  { %632 = vmatprep.subr.bf16.mxu1 %v755_v0  ;;  %648 = vmatprep.mubr.msk.bf16.mxu1 %vm756_vm0, %v755_v0  ;;  %v39_v3 = vpack.c.bf16 %v38_v2, %v38_v2  ;;  %v700_v6 = vld [vmem:[#allocation3 + $0x28] sm:$0xff]   ;;  %v701_v7 = vld [vmem:[#allocation3 + $0x20] sm:$0xff]   ;;  %v702_v8 = vld [vmem:[#allocation3 + $0x18] sm:$0xff]   ;;  %v813_v35 = vshrl.u32 %v117_v34, 7 }
  0x10   :  { %627 = vmatpush3.bf16.msra.mxu0 %v697_v1  ;;  %633 = vmatpush3.bf16.msra.mxu1 %v698_v4  ;;  %v703_v9 = vld [vmem:[#allocation3 + $0x10] sm:$0xff]   ;;  %v704_v10 = vld [vmem:[#allocation3 + $0x8] sm:$0xff]   ;;  %v705_v11 = vld [vmem:[#allocation3] sm:$0xff]  }
  0x11   :  { %652 = vmatprep.subr.bf16.mxu0 %v755_v0  ;;  %634 = vmatprep.subr.bf16.mxu1 %v755_v0  ;;  %v818_v36 = vld [vmem:[%s864_s3] sm:$0xff]  ;;  %v119_v39 = vsub.s32 0, %v813_v35  ;;  %v124_v43 = vsub.s32 4, %v813_v35  ;;  %v706_v50 = vld [vmem:[#allocation3 + $0x78] sm:$0xff]   ;;  %v707_v51 = vld [vmem:[#allocation3 + $0x70] sm:$0xff]  }
  0x12   :  { %v708_v52 = vld [vmem:[#allocation3 + $0x68] sm:$0xff]   ;;  %v709_v53 = vld [vmem:[#allocation3 + $0x60] sm:$0xff]   ;;  %v710_v54 = vld [vmem:[#allocation3 + $0x58] sm:$0xff]  }
  0x13   :  { %629 = vmatmul.mubr.msk.bf16.vlgmr.msra.gmra.mxu0 %vm48_vm1, %v39_v3  ;;  %v711_v55 = vld [vmem:[#allocation3 + $0x50] sm:$0xff]   ;;  %v712_v56 = vld [vmem:[#allocation3 + $0x48] sm:$0xff]   ;;  %v713_v57 = vld [vmem:[#allocation3 + $0x40] sm:$0xff]  }
  0x14   :  { %668 = vmatprep.mubr.msk.bf16.mxu0 %vm756_vm0, %v755_v0  ;;  %635 = vmatpush3.bf16.msra.mxu1 %v699_v5  ;;  %v718_v34 = vld [vmem:[#allocation3 + $0x98] sm:$0xff]  }
  0x15   :  { %636 = vmatprep.subr.bf16.mxu1 %v755_v0  ;;  %653 = vmatpush3.bf16.msra.mxu0 %v706_v50 }
  0x16   :  { %654 = vmatprep.subr.bf16.mxu0 %v755_v0 }
  0x18   :  { %637 = vmatpush3.bf16.msra.mxu1 %v700_v6 }
  0x19   :  { %638 = vmatprep.subr.bf16.mxu1 %v755_v0  ;;  %655 = vmatpush3.bf16.msra.mxu0 %v707_v51 }
  0x1a   :  { %656 = vmatprep.subr.bf16.mxu0 %v755_v0 }
  0x1c   :  { %639 = vmatpush3.bf16.msra.mxu1 %v701_v7 }
  0x1d   :  { %640 = vmatprep.subr.bf16.mxu1 %v755_v0  ;;  %657 = vmatpush3.bf16.msra.mxu0 %v708_v52 }
  0x1e   :  { %658 = vmatprep.subr.bf16.mxu0 %v755_v0 }
  0x20   :  { %641 = vmatpush3.bf16.msra.mxu1 %v702_v8 }
  0x21   :  { %642 = vmatprep.subr.bf16.mxu1 %v755_v0  ;;  %659 = vmatpush3.bf16.msra.mxu0 %v709_v53 }
  0x22   :  { %660 = vmatprep.subr.bf16.mxu0 %v755_v0 }
  0x24   :  { %643 = vmatpush3.bf16.msra.mxu1 %v703_v9 }
  0x25   :  { %644 = vmatprep.subr.bf16.mxu1 %v755_v0  ;;  %661 = vmatpush3.bf16.msra.mxu0 %v710_v54 }
  0x26   :  { %662 = vmatprep.subr.bf16.mxu0 %v755_v0 }
  0x28   :  { %645 = vmatpush3.bf16.msra.mxu1 %v704_v10 }
  0x29   :  { %646 = vmatprep.subr.bf16.mxu1 %v755_v0  ;;  %663 = vmatpush3.bf16.msra.mxu0 %v711_v55 }
  0x2a   :  { %664 = vmatprep.subr.bf16.mxu0 %v755_v0 }
  0x2c   :  { %647 = vmatpush3.bf16.msra.mxu1 %v705_v11 }
  0x2d   :  { %672 = vmatprep.subr.bf16.mxu1 %v755_v0  ;;  %665 = vmatpush3.bf16.msra.mxu0 %v712_v56 }
  0x2e   :  { %666 = vmatprep.subr.bf16.mxu0 %v755_v0 }
  0x31   :  { %667 = vmatpush3.bf16.msra.mxu0 %v713_v57 }
  0xd3   :  { %v86_v12 = vpop.f32.mrf.mxu0 }
  0xd4   :  { %v92_v13 = vrot.slane %v86_v12, 4  ;;  %v98_v14 = vmul.f32 %v86_v12, %v86_v12 }
  0xd5   :  { %v630_v15 = vpop.f32.mrf.mxu0 }
  0xd6   :  { %v93_v16 = vadd.f32 %v92_v13, %v86_v12  ;;  %v99_v17 = vrot.slane %v98_v14, 4 }
  0xd7   :  { %v89_v18 = vpop.f32.mrf.mxu0 }
  0xd8   :  { %v94_v19 = vrot.slane %v93_v16, 2  ;;  %v100_v20 = vadd.f32 %v99_v17, %v98_v14 }
  0xd9   :  { %v631_v21 = vpop.f32.mrf.mxu0 }
  0xda   :  { %v95_v22 = vadd.f32 %v94_v19, %v93_v16  ;;  %v101_v23 = vrot.slane %v100_v20, 2  ;;  %v260_v19 = vsub.s32 1, %v813_v35 }
  0xdc   :  { %v96_v24 = vrot.slane %v95_v22, 1  ;;  %v102_v25 = vadd.f32 %v101_v23, %v100_v20  ;;  %v265_v23 = vsub.s32 5, %v813_v35 }
  0xde   :  { %v97_v26 = vadd.f32 %v96_v24, %v95_v22  ;;  %v103_v27 = vrot.slane %v102_v25, 1 }
  0xe0   :  { %v104_v28 = vadd.f32 %v103_v27, %v102_v25  ;;  %v105_v29 = vmul.f32 0.125, %v97_v26 }
  0xe2   :  { %v106_v30 = vmul.f32 0.125, %v104_v28  ;;  %v107_v31 = vmul.f32 %v105_v29, %v105_v29 }
  0xe4   :  { %v108_v32 = vsub.f32 %v106_v30, %v107_v31  ;;  %v714_v30 = vld [vmem:[#allocation3 + $0xb8] sm:$0xff]   ;;  %v715_v31 = vld [vmem:[#allocation3 + $0xb0] sm:$0xff]  }
  0xe6   :  { %v109_v33 = vadd.f32 1e-05, %v108_v32  ;;  %v716_v32 = vld [vmem:[#allocation3 + $0xa8] sm:$0xff]  }
  0xe8   :  { %722 = vrsqrt.f32 %v109_v33  ;;  %v717_v33 = vld [vmem:[#allocation3 + $0xa0] sm:$0xff]  }
  0xf5   :  { %v723_v37 = vpop.eup %722 }
  0xf6   :  { %v111_v38 = vmul.f32 %v723_v37, %v818_v36  ;;  %v719_v37 = vld [vmem:[#allocation3 + $0x90] sm:$0xff]  }
  0xf8   :  { %v112_v40 = vmul.f32 %v111_v38, %v105_v29  ;;  %v120_v41 = vrot.slane %v111_v38, %v119_v39  ;;  %v720_v38 = vld [vmem:[#allocation3 + $0x88] sm:$0xff]   ;;  %v721_v39 = vld [vmem:[#allocation3 + $0x80] sm:$0xff]  }
  0xfa   :  { %v114_v42 = vrot.slane %v112_v40, 4  ;;  %v121_v45 = vmul.f32 %v120_v41, %v86_v12 }
  0xfc   :  { %v116_v44 = vsub.f32 %v818_v36, %v114_v42 }
  0xfe   :  { %v125_v46 = vrot.slane %v116_v44, %v124_v43 }
 0x100   :  { %v126_v47 = vadd.f32 %v125_v46, %v121_v45 }
 0x102   :  { %v127_v48 = vmax.f32 %v126_v47, 0.0 }
 0x104   :  { %v128_v49 = vpack.c.bf16 %v127_v48, %v127_v48 }
 0x106   :  { %649 = vmatmul.mubr.bf16.vlgmr.msra.gmra.mxu1 %v128_v49 }
 0x107   :  { %688 = vmatprep.mubr.msk.bf16.mxu1 %vm756_vm0, %v755_v0  ;;  %673 = vmatpush3.bf16.msra.mxu1 %v714_v30 }
 0x108   :  { %674 = vmatprep.subr.bf16.mxu1 %v755_v0 }
 0x10b   :  { %675 = vmatpush3.bf16.msra.mxu1 %v715_v31 }
 0x10c   :  { %676 = vmatprep.subr.bf16.mxu1 %v755_v0 }
 0x10f   :  { %677 = vmatpush3.bf16.msra.mxu1 %v716_v32 }
 0x110   :  { %678 = vmatprep.subr.bf16.mxu1 %v755_v0 }
 0x113   :  { %679 = vmatpush3.bf16.msra.mxu1 %v717_v33 }
 0x114   :  { %680 = vmatprep.subr.bf16.mxu1 %v755_v0 }
 0x117   :  { %681 = vmatpush3.bf16.msra.mxu1 %v718_v34 }
 0x118   :  { %682 = vmatprep.subr.bf16.mxu1 %v755_v0 }
 0x11b   :  { %683 = vmatpush3.bf16.msra.mxu1 %v719_v37  ;;  %v544_v37 = vsub.s32 3, %v813_v35 }
 0x11c   :  { %684 = vmatprep.subr.bf16.mxu1 %v755_v0 }
 0x11f   :  { %685 = vmatpush3.bf16.msra.mxu1 %v720_v38 }
 0x120   :  { %686 = vmatprep.subr.bf16.mxu1 %v755_v0 }
 0x123   :  { %687 = vmatpush3.bf16.msra.mxu1 %v721_v39 }
 0x1c6   :  { %v227_v58 = vpop.f32.mrf.mxu1 }
 0x1c7   :  { %v233_v59 = vrot.slane %v227_v58, 4  ;;  %v239_v60 = vmul.f32 %v227_v58, %v227_v58 }
 0x1c8   :  { %v650_v61 = vpop.f32.mrf.mxu1 }
 0x1c9   :  { %v234_v62 = vadd.f32 %v233_v59, %v227_v58  ;;  %v240_v63 = vrot.slane %v239_v60, 4 }
 0x1ca   :  { %v230_v1 = vpop.f32.mrf.mxu1 }
 0x1cb   :  { %v235_v2 = vrot.slane %v234_v62, 2  ;;  %v241_v3 = vadd.f32 %v240_v63, %v239_v60  ;;  %v402_v63 = vsub.s32 2, %v813_v35 }
 0x1cc   :  { %v651_v4 = vpop.f32.mrf.mxu1 }
 0x1cd   :  { %v236_v5 = vadd.f32 %v235_v2, %v234_v62  ;;  %v242_v6 = vrot.slane %v241_v3, 2  ;;  %v407_v4 = vsub.s32 6, %v813_v35 }
 0x1cf   :  { %v237_v7 = vrot.slane %v236_v5, 1  ;;  %v243_v8 = vadd.f32 %v242_v6, %v241_v3 }
 0x1d1   :  { %v238_v9 = vadd.f32 %v237_v7, %v236_v5  ;;  %v244_v10 = vrot.slane %v243_v8, 1 }
 0x1d3   :  { %v245_v11 = vadd.f32 %v244_v10, %v243_v8  ;;  %v246_v12 = vmul.f32 0.125, %v238_v9 }
 0x1d5   :  { %v247_v13 = vmul.f32 0.125, %v245_v11  ;;  %v248_v14 = vmul.f32 %v246_v12, %v246_v12 }
 0x1d7   :  { %v249_v15 = vsub.f32 %v247_v13, %v248_v14 }
 0x1d9   :  { %v250_v16 = vadd.f32 1e-05, %v249_v15 }
 0x1db   :  { %724 = vrsqrt.f32 %v250_v16 }
 0x1e8   :  { %v725_v17 = vpop.eup %724 }
 0x1e9   :  { %v252_v18 = vmul.f32 %v725_v17, %v818_v36 }
 0x1eb   :  { %v253_v20 = vmul.f32 %v252_v18, %v246_v12  ;;  %v261_v22 = vrot.slane %v252_v18, %v260_v19 }
 0x1ed   :  { %v255_v21 = vrot.slane %v253_v20, 4  ;;  %v262_v25 = vmul.f32 %v261_v22, %v227_v58 }
 0x1ef   :  { %v257_v24 = vsub.f32 %v818_v36, %v255_v21 }
 0x1f1   :  { %v266_v26 = vrot.slane %v257_v24, %v265_v23 }
 0x1f3   :  { %v267_v27 = vadd.f32 %v266_v26, %v262_v25 }
 0x1f5   :  { %v268_v28 = vmax.f32 %v267_v27, 0.0 }
 0x1f7   :  { %v269_v29 = vpack.c.bf16 %v268_v28, %v268_v28 }
 0x1f9   :  { %669 = vmatmul.mubr.bf16.vlgmr.msra.gmra.mxu0 %v269_v29 }
 0x2b9   :  { %v369_v40 = vpop.f32.mrf.mxu0 }
 0x2ba   :  { %v375_v41 = vrot.slane %v369_v40, 4  ;;  %v381_v42 = vmul.f32 %v369_v40, %v369_v40 }
 0x2bb   :  { %v670_v43 = vpop.f32.mrf.mxu0 }
 0x2bc   :  { %v376_v44 = vadd.f32 %v375_v41, %v369_v40  ;;  %v382_v45 = vrot.slane %v381_v42, 4  ;;  %v549_v41 = vsub.s32 7, %v813_v35 }
 0x2bd   :  { %v372_v46 = vpop.f32.mrf.mxu0 }
 0x2be   :  { %v377_v47 = vrot.slane %v376_v44, 2  ;;  %v383_v48 = vadd.f32 %v382_v45, %v381_v42  ;;  %v596_v46 = vld [vmem:[%s864_s3 + $0x8] ss:$0 sm:$0xff] }
 0x2bf   :  { %v671_v49 = vpop.f32.mrf.mxu0 }
 0x2c0   :  { %v378_v50 = vadd.f32 %v377_v47, %v376_v44  ;;  %v384_v51 = vrot.slane %v383_v48, 2  ;;  %v561_v49 = vstv %s865_s4 }
 0x2c2   :  { %v379_v52 = vrot.slane %v378_v50, 1  ;;  %v385_v53 = vadd.f32 %v384_v51, %v383_v48 }
 0x2c4   :  { %v380_v54 = vadd.f32 %v379_v52, %v378_v50  ;;  %v386_v55 = vrot.slane %v385_v53, 1 }
 0x2c6   :  { %v387_v56 = vadd.f32 %v386_v55, %v385_v53  ;;  %v388_v0 = vmul.f32 0.125, %v380_v54 }
 0x2c8   :  { %v389_v57 = vmul.f32 0.125, %v387_v56  ;;  %v390_v58 = vmul.f32 %v388_v0, %v388_v0 }
 0x2ca   :  { %v391_v59 = vsub.f32 %v389_v57, %v390_v58 }
 0x2cc   :  { %v392_v60 = vadd.f32 1e-05, %v391_v59 }
 0x2ce   :  { %726 = vrsqrt.f32 %v392_v60 }
 0x2db   :  { %v727_v61 = vpop.eup %726 }
 0x2dc   :  { %v394_v62 = vmul.f32 %v727_v61, %v818_v36 }
 0x2de   :  { %v395_v1 = vmul.f32 %v394_v62, %v388_v0  ;;  %v403_v3 = vrot.slane %v394_v62, %v402_v63 }
 0x2e0   :  { %v397_v2 = vrot.slane %v395_v1, 4  ;;  %v404_v6 = vmul.f32 %v403_v3, %v369_v40 }
 0x2e2   :  { %v399_v5 = vsub.f32 %v818_v36, %v397_v2 }
 0x2e4   :  { %v408_v7 = vrot.slane %v399_v5, %v407_v4 }
 0x2e6   :  { %v409_v8 = vadd.f32 %v408_v7, %v404_v6 }
 0x2e8   :  { %v410_v9 = vmax.f32 %v409_v8, 0.0 }
 0x2ea   :  { %v411_v10 = vpack.c.bf16 %v410_v9, %v410_v9 }
 0x2ec   :  { %689 = vmatmul.mubr.bf16.vlgmr.msra.gmra.mxu1 %v411_v10 }
 0x3ac   :  { %v511_v11 = vpop.f32.mrf.mxu1 }
 0x3ad   :  { %v517_v12 = vrot.slane %v511_v11, 4  ;;  %v523_v13 = vmul.f32 %v511_v11, %v511_v11 }
 0x3ae   :  { %v690_v14 = vpop.f32.mrf.mxu1 }
 0x3af   :  { %v518_v15 = vadd.f32 %v517_v12, %v511_v11  ;;  %v524_v16 = vrot.slane %v523_v13, 4 }
 0x3b0   :  { %v514_v17 = vpop.f32.mrf.mxu1 }
 0x3b1   :  { %v519_v18 = vrot.slane %v518_v15, 2  ;;  %v525_v19 = vadd.f32 %v524_v16, %v523_v13 }
 0x3b2   :  { %v691_v20 = vpop.f32.mrf.mxu1 }
 0x3b3   :  { %v520_v21 = vadd.f32 %v519_v18, %v518_v15  ;;  %v526_v22 = vrot.slane %v525_v19, 2 }
 0x3b5   :  { %v521_v23 = vrot.slane %v520_v21, 1  ;;  %v527_v24 = vadd.f32 %v526_v22, %v525_v19 }
 0x3b7   :  { %v522_v25 = vadd.f32 %v521_v23, %v520_v21  ;;  %v528_v26 = vrot.slane %v527_v24, 1 }
 0x3b9   :  { %v529_v27 = vadd.f32 %v528_v26, %v527_v24  ;;  %v530_v28 = vmul.f32 0.125, %v522_v25 }
 0x3bb   :  { %v531_v29 = vmul.f32 0.125, %v529_v27  ;;  %v532_v30 = vmul.f32 %v530_v28, %v530_v28 }
 0x3bd   :  { %v533_v31 = vsub.f32 %v531_v29, %v532_v30 }
 0x3bf   :  { %v534_v32 = vadd.f32 1e-05, %v533_v31 }
 0x3c1   :  { %728 = vrsqrt.f32 %v534_v32 }
 0x3ce   :  { %v729_v33 = vpop.eup %728 }
 0x3cf   :  { %v536_v34 = vmul.f32 %v729_v33, %v818_v36 }
 0x3d1   :  { %v537_v38 = vmul.f32 %v536_v34, %v530_v28  ;;  %v545_v40 = vrot.slane %v536_v34, %v544_v37 }
 0x3d3   :  { %v539_v39 = vrot.slane %v537_v38, 4  ;;  %v546_v43 = vmul.f32 %v545_v40, %v511_v11 }
 0x3d5   :  { %v541_v42 = vsub.f32 %v818_v36, %v539_v39 }
 0x3d7   :  { %v550_v44 = vrot.slane %v541_v42, %v549_v41 }
 0x3d9   :  { %v551_v45 = vadd.f32 %v550_v44, %v546_v43 }
 0x3db   :  { %v552_v47 = vmax.f32 %v551_v45, 0.0 }
 0x3dd   :  { %v557_v48 = vmul.f32 %v596_v46, %v552_v47 }
 0x3df   :  { %558 = vadd.xlane.f32.xlu0 %v557_v48 }
 0x468   :  { %v559_v50 = vpop.xlane.xlu0 %558 }
 0x469   :  { %v562_v51 = vadd.f32 %v561_v49, %v559_v50 }
 0x46b   :  { %564 = vst.msk [vmem:[%s866_s5] sm:$0xff] %vm563_vm2, %v562_v51 }
 0x46c   :  { %569 = vsyncpa [#allocation4], 1 }

</bundles_post_ra>
